<compile_context>
chip_gen: v7x
topology: tpu7x:2x2x1
jax: 0.10.0
libtpu: 0.0.40
codegen_flags: <defaults>
</compile_context>

<pallas_src>
import functools

import jax
import jax.numpy as jnp
from jax.experimental import pallas as pl
from jax.experimental.pallas import tpu as pltpu


def _convlstm_kernel(p_ref, w_ref, b_ref, c_ref, h_out_ref, c_out_ref,
                     *, hidden_dim):
    """One grid step = one batch tile.

    p_ref : (1, K, M)        bf16 im2col slab (K = KH*KW*Ctot, M = bt*H*W)
    w_ref : (4*Chid, K)      bf16 conv weight, output channels on sublanes
    b_ref : (4*Chid, 1)      f32 conv bias
    c_ref : (1, Chid, M)     current cell state
    h_out_ref, c_out_ref : (1, Chid, M)
    """
    # Single large-K MXU contraction, f32 accumulation (M=4*Chid, N=bt*H*W).
    acc = jnp.dot(w_ref[...], p_ref[0], preferred_element_type=jnp.float32)
    acc = acc + b_ref[...]                        # (4*Chid, 1) lane-broadcast

    # Gate split [i | f | o | g]: sublane-aligned row slices (no lane movement).
    cc_i = acc[0 * hidden_dim:1 * hidden_dim]
    cc_f = acc[1 * hidden_dim:2 * hidden_dim]
    cc_o = acc[2 * hidden_dim:3 * hidden_dim]
    cc_g = acc[3 * hidden_dim:4 * hidden_dim]

    i = jax.nn.sigmoid(cc_i)
    f = jax.nn.sigmoid(cc_f)
    o = jax.nn.sigmoid(cc_o)
    g = jnp.tanh(cc_g)

    c_cur = c_ref[0].astype(jnp.float32)
    c_next = f * c_cur + i * g
    h_next = o * jnp.tanh(c_next)

    # Lane-dense stores: last dim is M = bt*H*W (>= 256 here).
    h_out_ref[0] = h_next.astype(h_out_ref.dtype)
    c_out_ref[0] = c_next.astype(c_out_ref.dtype)


def _pick_batch_tile(B):
    """Fold batch into the matmul N dim, but keep the grid >= 2 (v7x dual TC)."""
    for bt in range(min(B, 8), 0, -1):
        if B % bt == 0 and B // bt >= 2:
            return bt
    return 1


def convlstm_cell(x, h_cur, c_cur, weight, bias, kernel_size, *, batch_tile=None):
    """ConvLSTMCell.forward, PyTorch NCHW layout.

    Returns (h_next, c_next), each (B, Chid, H, W), in h_cur.dtype.
    (For bias=False in the PyTorch module, pass a zero bias vector.)
    """
    B, Cin, H, W = x.shape
    Chid = h_cur.shape[1]
    KH, KW = kernel_size
    if KH % 2 != 1 or KW % 2 != 1:
        raise ValueError("padding = kernel_size // 2 ('same') requires odd kernel_size")
    ph, pw = KH // 2, KW // 2
    Ctot = Cin + Chid
    C4 = 4 * Chid
    K = KH * KW * Ctot
    HW = H * W

    bt = batch_tile if batch_tile is not None else _pick_batch_tile(B)
    assert B % bt == 0
    Bg = B // bt
    M = bt * HW
    state_dtype = h_cur.dtype

    # combined = cat([x, h], dim=1); cast MXU operands to bf16 (accumulate f32).
    comb = jnp.concatenate([x, h_cur], axis=1).astype(jnp.bfloat16)
    comb_p = jnp.pad(comb, ((0, 0), (0, 0), (ph, ph), (pw, pw)))

    # im2col slab, K ordered as ((kh*KW + kw)*Ctot + c).
    # TODO(synk): for large H*W, build this slab (or at least the kh halo)
    # in-kernel via manual DMA instead of materializing ~KH*KW x the input in
    # HBM, and add an H-tiling path for v7x's smaller (64 MiB) VMEM.
    cols = []
    for kh in range(KH):
        for kw in range(KW):
            cols.append(comb_p[:, :, kh:kh + H, kw:kw + W].reshape(B, Ctot, HW))
    patches = jnp.concatenate(cols, axis=1)                      # (B, K, HW)

    # Conv weight -> (4*Chid, K) with the same K ordering; bias column vector.
    w2 = jnp.transpose(weight, (0, 2, 3, 1)).reshape(C4, K).astype(jnp.bfloat16)
    b2 = bias.reshape(C4, 1).astype(jnp.float32)

    # Fold bt batch elements into the spatial (lane) axis.
    def fold(a, C):                       # (B, C, HW) -> (Bg, C, bt*HW)
        a = a.reshape(Bg, bt, C, HW)
        return jnp.transpose(a, (0, 2, 1, 3)).reshape(Bg, C, M)

    def unfold(a, C):                     # (Bg, C, bt*HW) -> (B, C, H, W)
        a = a.reshape(Bg, C, bt, HW)
        return jnp.transpose(a, (0, 2, 1, 3)).reshape(B, C, H, W)

    patches = fold(patches, K)
    c_in = fold(c_cur.reshape(B, Chid, HW), Chid)

    kernel = functools.partial(_convlstm_kernel, hidden_dim=Chid)

    grid_spec = pltpu.PrefetchScalarGridSpec(
        num_scalar_prefetch=0,
        grid=(Bg,),
        in_specs=[
            pl.BlockSpec((1, K, M), lambda b: (b, 0, 0)),       # im2col slab
            pl.BlockSpec((C4, K), lambda b: (0, 0)),            # weight
            pl.BlockSpec((C4, 1), lambda b: (0, 0)),            # bias
            pl.BlockSpec((1, Chid, M), lambda b: (b, 0, 0)),    # c_cur
        ],
        out_specs=[
            pl.BlockSpec((1, Chid, M), lambda b: (b, 0, 0)),
            pl.BlockSpec((1, Chid, M), lambda b: (b, 0, 0)),
        ],
    )

    h_flat, c_flat = pl.pallas_call(
        kernel,
        out_shape=(
            jax.ShapeDtypeStruct((Bg, Chid, M), state_dtype),
            jax.ShapeDtypeStruct((Bg, Chid, M), state_dtype),
        ),
        grid_spec=grid_spec,
        compiler_params=pltpu.CompilerParams(
            dimension_semantics=("parallel",)),
    )(patches, w2, b2, c_in)

    return unfold(h_flat, Chid), unfold(c_flat, Chid)


def _reference_convlstm(x, h_cur, c_cur, weight, bias):
    """Pure-JAX f32 reference (NCHW, same as the PyTorch module)."""
    combined = jnp.concatenate([x, h_cur], axis=1)
    conv = jax.lax.conv_general_dilated(
        combined, weight, window_strides=(1, 1), padding="SAME",
        dimension_numbers=("NCHW", "OIHW", "NCHW"))
    conv = conv + bias[None, :, None, None]
    Chid = h_cur.shape[1]
    cc_i = conv[:, 0 * Chid:1 * Chid]
    cc_f = conv[:, 1 * Chid:2 * Chid]
    cc_o = conv[:, 2 * Chid:3 * Chid]
    cc_g = conv[:, 3 * Chid:4 * Chid]
    i = jax.nn.sigmoid(cc_i)
    f = jax.nn.sigmoid(cc_f)
    o = jax.nn.sigmoid(cc_o)
    g = jnp.tanh(cc_g)
    c_next = f * c_cur + i * g
    h_next = o * jnp.tanh(c_next)
    return h_next, c_next


if __name__ == "__main__":
    B, H, W = 2, 16, 16
    input_dim, hidden_dim = 4, 32
    kernel_size = (3, 3)
    KH, KW = kernel_size
    Ctot = input_dim + hidden_dim

    key = jax.random.PRNGKey(0)
    kx, kh, kc, kw_, kb = jax.random.split(key, 5)

    x = jax.random.normal(kx, (B, input_dim, H, W), jnp.float32)
    h_cur = jax.random.normal(kh, (B, hidden_dim, H, W), jnp.float32)
    c_cur = jax.random.normal(kc, (B, hidden_dim, H, W), jnp.float32)

    # nn.Conv2d(Ctot, 4*hidden, 3, padding=1) shaped parameters (OIHW).
    fan_in = Ctot * KH * KW
    bound = 1.0 / (fan_in ** 0.5)
    weight = jax.random.uniform(
        kw_, (4 * hidden_dim, Ctot, KH, KW), jnp.float32, -bound, bound)
    bias = jax.random.uniform(kb, (4 * hidden_dim,), jnp.float32, -bound, bound)

    h_next, c_next = convlstm_cell(x, h_cur, c_cur, weight, bias, kernel_size)
    jax.block_until_ready((h_next, c_next))

    h_ref, c_ref = _reference_convlstm(x, h_cur, c_cur, weight, bias)
    # bf16 MXU operands (f32 accumulation) -> compare with a matching tolerance.
    assert jnp.allclose(h_next, h_ref, atol=3e-2, rtol=3e-2), float(
        jnp.max(jnp.abs(h_next - h_ref)))
    assert jnp.allclose(c_next, c_ref, atol=3e-2, rtol=3e-2), float(
        jnp.max(jnp.abs(c_next - c_ref)))

    print("KERNEL_OK")
</pallas_src>

<mosaic_0001>
module attributes {stable_mosaic.version = 11 : i64} {
  func.func @_convlstm_kernel(%arg0: i32, %arg1: memref<1x324x256xbf16, #tpu.memory_space<vmem>>, %arg2: memref<128x324xbf16, #tpu.memory_space<vmem>>, %arg3: memref<128x1xf32, #tpu.memory_space<vmem>>, %arg4: memref<1x32x256xf32, #tpu.memory_space<vmem>>, %arg5: memref<1x32x256xf32, #tpu.memory_space<vmem>>, %arg6: memref<1x32x256xf32, #tpu.memory_space<vmem>>) attributes {dimension_semantics = [#tpu.dimension_semantics<parallel>], iteration_bounds = array<i64: 2>, scalar_prefetch = 0 : i64, scratch_operands = 0 : i64, tpu.core_type = #tpu.core_type<tc>, window_params = [{transform_indices = @transform_0, window_bounds = array<i64: 1, 324, 256>}, {pipeline_mode = #tpu.pipeline_mode<synchronous>, transform_indices = @transform_1, window_bounds = array<i64: 128, 324>}, {pipeline_mode = #tpu.pipeline_mode<synchronous>, transform_indices = @transform_2, window_bounds = array<i64: 128, 1>}, {transform_indices = @transform_3, window_bounds = array<i64: 1, 32, 256>}, {transform_indices = @transform_4, window_bounds = array<i64: 1, 32, 256>}, {transform_indices = @transform_5, window_bounds = array<i64: 1, 32, 256>}]} {
    %c0 = arith.constant 0 : index
    %c0_0 = arith.constant 0 : index
    %0 = vector.load %arg2[%c0, %c0_0] : memref<128x324xbf16, #tpu.memory_space<vmem>>, vector<128x324xbf16>
    %c0_1 = arith.constant 0 : index
    %c0_2 = arith.constant 0 : index
    %c0_3 = arith.constant 0 : index
    %1 = vector.load %arg1[%c0_1, %c0_2, %c0_3] : memref<1x324x256xbf16, #tpu.memory_space<vmem>>, vector<1x324x256xbf16>
    %2 = vector.shape_cast %1 : vector<1x324x256xbf16> to vector<324x256xbf16>
    %cst = arith.constant dense<0.000000e+00> : vector<128x256xf32>
    %3 = tpu.matmul %0, %2, %cst {dimension_numbers = #tpu.dot_dimension_numbers<[1], [0], [0], [1], [0, 0, 1, 1], [], []>} : vector<128x324xbf16>, vector<324x256xbf16>, vector<128x256xf32> -> vector<128x256xf32>
    %c0_4 = arith.constant 0 : index
    %c0_5 = arith.constant 0 : index
    %4 = vector.load %arg3[%c0_4, %c0_5] : memref<128x1xf32, #tpu.memory_space<vmem>>, vector<128x1xf32>
    %5 = vector.broadcast %4 : vector<128x1xf32> to vector<128x256xf32>
    %6 = arith.addf %3, %5 : vector<128x256xf32>
    %7 = vector.extract_strided_slice %6 {offsets = [0, 0], sizes = [32, 256], strides = [1, 1]} : vector<128x256xf32> to vector<32x256xf32>
    %8 = vector.extract_strided_slice %6 {offsets = [32, 0], sizes = [32, 256], strides = [1, 1]} : vector<128x256xf32> to vector<32x256xf32>
    %9 = vector.extract_strided_slice %6 {offsets = [64, 0], sizes = [32, 256], strides = [1, 1]} : vector<128x256xf32> to vector<32x256xf32>
    %10 = vector.extract_strided_slice %6 {offsets = [96, 0], sizes = [32, 256], strides = [1, 1]} : vector<128x256xf32> to vector<32x256xf32>
    %11 = arith.negf %7 : vector<32x256xf32>
    %12 = math.exp %11 : vector<32x256xf32>
    %cst_6 = arith.constant 1.000000e+00 : f32
    %13 = vector.broadcast %cst_6 : f32 to vector<32x256xf32>
    %14 = arith.addf %13, %12 : vector<32x256xf32>
    %15 = arith.divf %13, %14 : vector<32x256xf32>
    %16 = arith.negf %8 : vector<32x256xf32>
    %17 = math.exp %16 : vector<32x256xf32>
    %cst_7 = arith.constant 1.000000e+00 : f32
    %18 = vector.broadcast %cst_7 : f32 to vector<32x256xf32>
    %19 = arith.addf %18, %17 : vector<32x256xf32>
    %20 = arith.divf %18, %19 : vector<32x256xf32>
    %21 = arith.negf %9 : vector<32x256xf32>
    %22 = math.exp %21 : vector<32x256xf32>
    %cst_8 = arith.constant 1.000000e+00 : f32
    %23 = vector.broadcast %cst_8 : f32 to vector<32x256xf32>
    %24 = arith.addf %23, %22 : vector<32x256xf32>
    %25 = arith.divf %23, %24 : vector<32x256xf32>
    %26 = math.tanh %10 : vector<32x256xf32>
    %c0_9 = arith.constant 0 : index
    %c0_10 = arith.constant 0 : index
    %c0_11 = arith.constant 0 : index
    %27 = vector.load %arg4[%c0_9, %c0_10, %c0_11] : memref<1x32x256xf32, #tpu.memory_space<vmem>>, vector<1x32x256xf32>
    %28 = vector.shape_cast %27 : vector<1x32x256xf32> to vector<32x256xf32>
    %29 = arith.mulf %20, %28 : vector<32x256xf32>
    %30 = arith.mulf %15, %26 : vector<32x256xf32>
    %31 = arith.addf %29, %30 : vector<32x256xf32>
    %32 = math.tanh %31 : vector<32x256xf32>
    %33 = arith.mulf %25, %32 : vector<32x256xf32>
    %c0_12 = arith.constant 0 : index
    %c0_13 = arith.constant 0 : index
    %c0_14 = arith.constant 0 : index
    %34 = vector.load %arg5[%c0_12, %c0_13, %c0_14] : memref<1x32x256xf32, #tpu.memory_space<vmem>>, vector<1x32x256xf32>
    %35 = vector.shape_cast %34 : vector<1x32x256xf32> to vector<32x256xf32>
    %36 = vector.shape_cast %33 : vector<32x256xf32> to vector<1x32x256xf32>
    tpu.vector_store %arg5[%c0_12, %c0_13, %c0_14], %36 {strides = array<i32>} : memref<1x32x256xf32, #tpu.memory_space<vmem>>, vector<1x32x256xf32>,
    %c0_15 = arith.constant 0 : index
    %c0_16 = arith.constant 0 : index
    %c0_17 = arith.constant 0 : index
    %37 = vector.load %arg6[%c0_15, %c0_16, %c0_17] : memref<1x32x256xf32, #tpu.memory_space<vmem>>, vector<1x32x256xf32>
    %38 = vector.shape_cast %37 : vector<1x32x256xf32> to vector<32x256xf32>
    %39 = vector.shape_cast %31 : vector<32x256xf32> to vector<1x32x256xf32>
    tpu.vector_store %arg6[%c0_15, %c0_16, %c0_17], %39 {strides = array<i32>} : memref<1x32x256xf32, #tpu.memory_space<vmem>>, vector<1x32x256xf32>,
    return
  }
  func.func @transform_0(%arg0: i32) -> (i32, i32, i32) {
    %c0_i32 = arith.constant 0 : i32
    %c0_i32_0 = arith.constant 0 : i32
    %c0_i32_1 = arith.constant 0 : i32
    return %arg0, %c0_i32, %c0_i32_0 : i32, i32, i32
  }
  func.func @transform_1(%arg0: i32) -> (i32, i32) {
    %c0_i32 = arith.constant 0 : i32
    %c0_i32_0 = arith.constant 0 : i32
    %c0_i32_1 = arith.constant 0 : i32
    return %c0_i32, %c0_i32_0 : i32, i32
  }
  func.func @transform_2(%arg0: i32) -> (i32, i32) {
    %c0_i32 = arith.constant 0 : i32
    %c0_i32_0 = arith.constant 0 : i32
    %c0_i32_1 = arith.constant 0 : i32
    return %c0_i32, %c0_i32_0 : i32, i32
  }
  func.func @transform_3(%arg0: i32) -> (i32, i32, i32) {
    %c0_i32 = arith.constant 0 : i32
    %c0_i32_0 = arith.constant 0 : i32
    %c0_i32_1 = arith.constant 0 : i32
    return %arg0, %c0_i32, %c0_i32_0 : i32, i32, i32
  }
  func.func @transform_4(%arg0: i32) -> (i32, i32, i32) {
    %c0_i32 = arith.constant 0 : i32
    %c0_i32_0 = arith.constant 0 : i32
    %c0_i32_1 = arith.constant 0 : i32
    return %arg0, %c0_i32, %c0_i32_0 : i32, i32, i32
  }
  func.func @transform_5(%arg0: i32) -> (i32, i32, i32) {
    %c0_i32 = arith.constant 0 : i32
    %c0_i32_0 = arith.constant 0 : i32
    %c0_i32_1 = arith.constant 0 : i32
    return %arg0, %c0_i32, %c0_i32_0 : i32, i32, i32
  }
}

</mosaic_0001>

<bundles_post_ra>
// kernel: tpu_custom_call.1
= control target key start
LH: loop header
LB: loop body
LE: loop exit
PB: predicated region body
PF: predicated region fallthrough
CT: control target
= control target key end

     0   :  { %11 = vsyncpa [#allocation3], 0  ;;  %s2432_s0 = inlined_call_operand.vmem [shape: bf16[2,324,256], index: 0, kind: input, shape index: {}]   ;;  %s2433_s1 = inlined_call_operand.vmem [shape: bf16[128,324], index: 1, kind: input, shape index: {}]   ;;  %s2434_s2 = inlined_call_operand.vmem [shape: f32[128,1], index: 2, kind: input, shape index: {}]   ;;  %s2435_s3 = inlined_call_operand.vmem [shape: f32[2,32,256], index: 3, kind: input, shape index: {}]   ;;  %s2436_s4 = inlined_call_operand.hbm [shape: f32[2,32,256], index: 4, kind: output, shape index: {0}]   ;;  %s2437_s5 = inlined_call_operand.hbm [shape: f32[2,32,256], index: 5, kind: output, shape index: {1}]  }
   0x1   :  { %13 = vsyncpa [#allocation3 + $0x1], 0 }
   0x2   :  { %14 = vsyncpa [#allocation5], 0 }
   0x3   :  { %16 = vsyncpa [#allocation5 + $0x1], 0  ;;  %s1950_s18 = smov 0   ;;  %s1952_s19 = smov 0  }
   0x4   :  { %s1954_s20 = smov 0   ;;  %s1956_s21 = smov 0  }
   0x5 LB: > { %s1971_s22 = sadd.s32 4294967295, %s1913_s21   ;;  %s1364_s23 = sadd.s32 4294967294, %s1913_s21   ;;  %s1913_s21 = sphi %s1956_s21, %s2443_s21   ;;  %s1909_s20 = sphi %s1954_s20, %s2442_s20   ;;  %s1905_s19 = sphi %s1952_s19, %s2441_s19   ;;  %s1901_s18 = sphi %s1950_s18, %s2440_s18  }
   0x6   : > { %s1975_s24 = sadd.s32 1, %s1913_s21   ;;  %s123_s25 = sadd.s32 1, %s1909_s20 }
   0x7   : > { %s120_s26 = ssub.s32 %s1913_s21, %s1975_s24  ;;  %p133_p0 = scmp.ne.s32.totalorder %s1909_s20, %s1905_s19 }
   0x8   : > { %p121_p1 = scmp.eq.s32.totalorder %s120_s26, 0  ;;  %p134_p2 = scmp.eq.s32.totalorder %s1971_s22, 1 }
   0x9   : > { %p139_p3 = scmp.ne.s32.totalorder %s1905_s19, %s1901_s18  ;;  %p140_p4 = scmp.eq.s32.totalorder %s1364_s23, 1 }
   0xa   : > { %s1986_s27 = scalar_select %p121_p1, %s1909_s20, %s123_s25  }
   0xb   : > { %p1988_p5 = por %p134_p2, %p133_p0  ;;  %p1992_p6 = por %p140_p4, %p139_p3 }
   0xc   : > { %p1367_p7 = scmp.ge.s32.totalorder %s1913_s21, 1  ;;  %p206_p8 = scmp.lt.s32.totalorder %s1913_s21, 3 }
   0xe   : > { %p207_p9 = pnand %p1367_p7, %p206_p8 }
   0xf   : > { %p244_p10 = scmp.lt.s32.totalorder (!%p207_p9), %s1971_s22, 1  ;;  %v1915_v0 = vmov (!%p207_p9), 0   ;;  %v1661_v1 = vld [vmem:[%s2433_s1 + $0x4] ss:$12 sps:$4 sm:$0xff] (!%p207_p9)   ;;  %vm774_vm0 = vcmask (!%p207_p9), 1041408   ;;  %vm749_vm1 = vcmask (!%p207_p9), 556032  }
  0x10   : > { %210 = sbr.rel (%p207_p9) target bundleno = 428 (0x1ac), region = 36  ;;  %926 = vmatprep.mubr.bf16.mxu0 (!%p207_p9), %v1915_v0  ;;  %1595 = vset.pattern.permute.xlu0 (!%p207_p9), %v1915_v0  ;;  %v1662_v33 = vld [vmem:[%s2433_s1 + $0x8] ss:$12 sps:$4 sm:$0xff] (!%p207_p9)   ;;  %v328_v37 = vld [vmem:[%s2434_s2] sm:$0xff] (!%p207_p9)  ;;  %v331_v42 = vld [vmem:[%s2434_s2 + $0x18] sm:$0xff] (!%p207_p9)  ;;  %s1481_s6 = sshll.u32 (!%p207_p9), %s1971_s22, 10 }
  0x11   : > { %1596 = vset.pattern.permute.xlu1 (!%p207_p9), %v1915_v0  ;;  %813 = vmatprep.mubr.bf16.mxu1 (!%p207_p9), %v1661_v1  ;;  %v330_v38 = vld [vmem:[%s2434_s2 + $0x10] sm:$0xff] (!%p207_p9)  ;;  %v1665_v40 = vld [vmem:[%s2433_s1 + $0x20] ss:$12 sps:$4 sm:$0xff] (!%p207_p9)   ;;  %v1669_v49 = vld [vmem:[%s2433_s1 + $0x38] ss:$12 sps:$4 sm:$0xff] (!%p207_p9)   ;;  %s2339_s13 = scalar_lea.hbm (!%p207_p9), %s2437_s5, %s1481_s6  ;;  %s1916_s16 = smov (!%p207_p9), [#allocation4]  }
  0x12   : > { %346 = vperm.xlu0 (!%p207_p9), %1595, %v328_v37   ;;  %v329_v41 = vld [vmem:[%s2434_s2 + $0x8] sm:$0xff] (!%p207_p9)  ;;  %356 = vperm.xlu1 (!%p207_p9), %1596, %v330_v38   ;;  %v332_v45 = vld [vmem:[%s2434_s2 + $0x20] sm:$0xff] (!%p207_p9)  ;;  %v334_v50 = vld [vmem:[%s2434_s2 + $0x30] sm:$0xff] (!%p207_p9) }
  0x13   : > { %v333_v46 = vld [vmem:[%s2434_s2 + $0x28] sm:$0xff] (!%p207_p9)  ;;  %v335_v51 = vld [vmem:[%s2434_s2 + $0x38] sm:$0xff] (!%p207_p9)  ;;  %v336_v54 = vld [vmem:[%s2434_s2 + $0x40] sm:$0xff] (!%p207_p9) }
  0x14   : > { %v337_v55 = vld [vmem:[%s2434_s2 + $0x48] sm:$0xff] (!%p207_p9)  ;;  %v1673_v58 = vld [vmem:[%s2433_s1 + $0x50] ss:$12 sps:$4 sm:$0xff] (!%p207_p9)   ;;  %v340_v62 = vld [vmem:[%s2434_s2 + $0x60] sm:$0xff] (!%p207_p9) }
  0x15   : > { %v338_v59 = vld [vmem:[%s2434_s2 + $0x50] sm:$0xff] (!%p207_p9)  ;;  %v339_v60 = vld [vmem:[%s2434_s2 + $0x58] sm:$0xff] (!%p207_p9)  ;;  %v1659_v63 = vld [vmem:[%s2433_s1] ss:$12 sps:$4 sm:$0xff] (!%p207_p9)  }
  0x16   : > { %351 = vperm.xlu0 (!%p207_p9), %1595, %v329_v41   ;;  %361 = vperm.xlu1 (!%p207_p9), %1596, %v331_v42   ;;  %v341_v1 = vld [vmem:[%s2434_s2 + $0x68] sm:$0xff] (!%p207_p9) }
  0x17   : > { %s2005_s7 = scalar_select %p244_p10, %s1971_s22, 1 }
  0x19   : > { %s1547_s8 = smul.u32 328, %s2005_s7  ;;  %s1480_s17 = sshll.u32 %s2005_s7, 6 }
  0x1a   : > { %366 = vperm.xlu0 %1595, %v332_v45   ;;  %371 = vperm.xlu1 %1596, %v333_v46   ;;  %s2278_s26 = scalar_lea.vmem %s2435_s3, %s1480_s17  ;;  %s2281_s7 = sand.u32 1, %s1905_s19  }
  0x1b   : > { %s2012_s11 = scalar_lea.vmem %s2432_s0, %s1547_s8  ;;  %s1368_s30 = sshll.u32 %s2281_s7, 6 }
  0x1c   : > { %v1597_v2 = vld [vmem:[%s2012_s11 + $0x4] ss:$8 sps:$4 sm:$0xff]   ;;  %v1599_v3 = vld [vmem:[%s2012_s11] ss:$8 sps:$4 sm:$0xff]   ;;  %v1600_v4 = vld [vmem:[%s2012_s11 + $0x14] ss:$8 sps:$4 sm:$0xff]  }
  0x1d   : > { %781 = vmatprep.subr.bf16.mxu1 %v1597_v2  ;;  %v1602_v5 = vld [vmem:[%s2012_s11 + $0x10] ss:$8 sps:$4 sm:$0xff]   ;;  %v1603_v6 = vld [vmem:[%s2012_s11 + $0x24] ss:$8 sps:$4 sm:$0xff]   ;;  %v1605_v7 = vld [vmem:[%s2012_s11 + $0x20] ss:$8 sps:$4 sm:$0xff]  }
  0x1e   : > { %782 = vmatpush1.bf16.msra.mxu1 %v1599_v3  ;;  %v1606_v8 = vld [vmem:[%s2012_s11 + $0x34] ss:$8 sps:$4 sm:$0xff]   ;;  %v1608_v9 = vld [vmem:[%s2012_s11 + $0x30] ss:$8 sps:$4 sm:$0xff]   ;;  %v1609_v10 = vld [vmem:[%s2012_s11 + $0x44] ss:$8 sps:$4 sm:$0xff]   ;;  %376 = vperm.xlu0 %1595, %v334_v50  }
  0x1f   : > { %783 = vmatprep.subr.bf16.mxu1 %v1600_v4  ;;  %v1611_v11 = vld [vmem:[%s2012_s11 + $0x40] ss:$8 sps:$4 sm:$0xff]   ;;  %v1630_v12 = vld [vmem:[%s2012_s11 + $0x104] ss:$8 sps:$4 sm:$0xff]   ;;  %v1612_v13 = vld [vmem:[%s2012_s11 + $0x54] ss:$8 sps:$4 sm:$0xff]   ;;  %381 = vperm.xlu1 %1596, %v335_v51  }
  0x20   : > { %v1634_v14 = vld [vmem:[%s2012_s11 + $0x100] ss:$8 sps:$4 sm:$0xff]   ;;  %894 = vmatprep.subr.bf16.mxu0 %v1630_v12  ;;  %v1636_v15 = vld [vmem:[%s2012_s11 + $0x114] ss:$8 sps:$4 sm:$0xff]   ;;  %v1614_v16 = vld [vmem:[%s2012_s11 + $0x50] ss:$8 sps:$4 sm:$0xff]  }
  0x21   : > { %895 = vmatpush1.bf16.msra.mxu0 %v1634_v14  ;;  %v1615_v17 = vld [vmem:[%s2012_s11 + $0x64] ss:$8 sps:$4 sm:$0xff]   ;;  %v1640_v18 = vld [vmem:[%s2012_s11 + $0x110] ss:$8 sps:$4 sm:$0xff]   ;;  %v1617_v20 = vld [vmem:[%s2012_s11 + $0x60] ss:$8 sps:$4 sm:$0xff]  }
  0x22   : > { %784 = vmatpush1.bf16.msra.mxu1 %v1602_v5  ;;  %896 = vmatprep.subr.bf16.mxu0 %v1636_v15  ;;  %v1642_v19 = vld [vmem:[%s2012_s11 + $0x124] ss:$8 sps:$4 sm:$0xff]   ;;  %v1646_v21 = vld [vmem:[%s2012_s11 + $0x120] ss:$8 sps:$4 sm:$0xff]   ;;  %v1648_v22 = vld [vmem:[%s2012_s11 + $0x134] ss:$8 sps:$4 sm:$0xff]  }
  0x23   : > { %785 = vmatprep.subr.bf16.mxu1 %v1603_v6  ;;  %v1618_v23 = vld [vmem:[%s2012_s11 + $0x74] ss:$8 sps:$4 sm:$0xff]   ;;  %v327_v24 = vld [vmem:[%s2012_s11 + $0x140] sm:$0x33]  ;;  %v1652_v25 = vld [vmem:[%s2012_s11 + $0x130] ss:$8 sps:$4 sm:$0xff]   ;;  %386 = vperm.xlu0 %1595, %v336_v54  }
  0x24   : > { %v1620_v26 = vld [vmem:[%s2012_s11 + $0x70] ss:$8 sps:$4 sm:$0xff]   ;;  %v1438_v27 = vcombine.high %v327_v24, %v327_v24  ;;  %v1437_v28 = vcombine.low %v327_v24, %v327_v24  ;;  %v1621_v29 = vld [vmem:[%s2012_s11 + $0x84] ss:$8 sps:$4 sm:$0xff]   ;;  %v1623_v30 = vld [vmem:[%s2012_s11 + $0x80] ss:$8 sps:$4 sm:$0xff]   ;;  %391 = vperm.xlu1 %1596, %v337_v55  }
  0x25   : > { %897 = vmatpush1.bf16.msra.mxu0 %v1640_v18  ;;  %v1624_v32 = vld [vmem:[%s2012_s11 + $0x94] ss:$8 sps:$4 sm:$0xff]   ;;  %v1626_v34 = vld [vmem:[%s2012_s11 + $0x90] ss:$8 sps:$4 sm:$0xff]   ;;  %v1627_v35 = vld [vmem:[%s2012_s11 + $0xa4] ss:$8 sps:$4 sm:$0xff]  }
  0x26   : > { %786 = vmatpush1.bf16.msra.mxu1 %v1605_v7  ;;  %898 = vmatprep.subr.bf16.mxu0 %v1642_v19  ;;  %v776_v31 = vsel %vm774_vm0, %v1437_v28, 0  ;;  %v1629_v36 = vld [vmem:[%s2012_s11 + $0xa0] ss:$8 sps:$4 sm:$0xff]   ;;  %v1632_v39 = vld [vmem:[%s2012_s11 + $0xb4] ss:$8 sps:$4 sm:$0xff]   ;;  %s2329_s9 = scalar_lea.vmem [#allocation2], %s1368_s30 }
  0x27   : > { %787 = vmatprep.subr.bf16.mxu1 %v1606_v8  ;;  %v1635_v43 = vld [vmem:[%s2012_s11 + $0xb0] ss:$8 sps:$4 sm:$0xff]   ;;  %v1638_v44 = vld [vmem:[%s2012_s11 + $0xc4] ss:$8 sps:$4 sm:$0xff]   ;;  %v1641_v47 = vld [vmem:[%s2012_s11 + $0xc0] ss:$8 sps:$4 sm:$0xff]   ;;  %396 = vperm.xlu0 %1595, %v338_v59  }
  0x28   : > { %v1644_v48 = vld [vmem:[%s2012_s11 + $0xd4] ss:$8 sps:$4 sm:$0xff]   ;;  %v1647_v52 = vld [vmem:[%s2012_s11 + $0xd0] ss:$8 sps:$4 sm:$0xff]   ;;  %v1650_v53 = vld [vmem:[%s2012_s11 + $0xe4] ss:$8 sps:$4 sm:$0xff]   ;;  %401 = vperm.xlu1 %1596, %v339_v60  }
  0x29   : > { %899 = vmatpush1.bf16.msra.mxu0 %v1646_v21  ;;  %v1653_v56 = vld [vmem:[%s2012_s11 + $0xe0] ss:$8 sps:$4 sm:$0xff]   ;;  %v1655_v57 = vld [vmem:[%s2012_s11 + $0xf4] ss:$8 sps:$4 sm:$0xff]   ;;  %v1658_v61 = vld [vmem:[%s2012_s11 + $0xf0] ss:$8 sps:$4 sm:$0xff]  }
  0x2a   : > { %788 = vmatpush1.bf16.msra.mxu1 %v1608_v9  ;;  %900 = vmatprep.subr.bf16.mxu0 %v1648_v22  ;;  %v1663_v2 = vld [vmem:[%s2433_s1 + $0x1c] ss:$12 sps:$4 sm:$0xff]   ;;  %v342_v4 = vld [vmem:[%s2434_s2 + $0x70] sm:$0xff]  ;;  %v1666_v6 = vld [vmem:[%s2433_s1 + $0x18] ss:$12 sps:$4 sm:$0xff]   ;;  %s2301_s11 = scalar_lea.vmem [#allocation4], %s1368_s30 }
  0x2b   : > { %789 = vmatprep.subr.bf16.mxu1 %v1609_v10  ;;  %406 = vperm.xlu0 %1595, %v340_v62   ;;  %v1677_v3 = vld [vmem:[%s2433_s1 + $0x68] ss:$12 sps:$4 sm:$0xff]   ;;  %v343_v5 = vld [vmem:[%s2434_s2 + $0x78] sm:$0xff]  ;;  %v1681_v8 = vld [vmem:[%s2433_s1 + $0x80] ss:$12 sps:$4 sm:$0xff]   ;;  %s1258_s8 = sshll.u32 %s2301_s11, 4  ;;  %s2341_s8 = int_to_ptr.vmem [resolvable:$true] %s1258_s8 }
  0x2c   : > { %411 = vperm.xlu1 %1596, %v341_v1   ;;  %v1667_v7 = vld [vmem:[%s2433_s1 + $0x34] ss:$12 sps:$4 sm:$0xff]   ;;  %v1670_v9 = vld [vmem:[%s2433_s1 + $0x30] ss:$12 sps:$4 sm:$0xff]   ;;  %v1671_v10 = vld [vmem:[%s2433_s1 + $0x4c] ss:$12 sps:$4 sm:$0xff]  }
  0x2d   : > { %901 = vmatpush1.bf16.msra.mxu0 %v1652_v25  ;;  %v1674_v12 = vld [vmem:[%s2433_s1 + $0x48] ss:$12 sps:$4 sm:$0xff]   ;;  %v1689_v14 = vld [vmem:[%s2433_s1 + $0xb0] ss:$12 sps:$4 sm:$0xff]   ;;  %v1678_v15 = vld [vmem:[%s2433_s1 + $0x60] ss:$12 sps:$4 sm:$0xff]  }
  0x2e   : > { %790 = vmatpush1.bf16.msra.mxu1 %v1611_v11  ;;  %1439 = vmatprep.subr.msk.bf16.mxu0 %vm774_vm0, %v1438_v27  ;;  %v1685_v11 = vld [vmem:[%s2433_s1 + $0x98] ss:$12 sps:$4 sm:$0xff]   ;;  %v1686_v18 = vld [vmem:[%s2433_s1 + $0x90] ss:$12 sps:$4 sm:$0xff]   ;;  %s1229_s14 = scalar_lea.sflag [#allocation5], %s2281_s7  ;;  %s1819_s15 = scalar_lea.vmem %s2341_s8, 1024 }
  0x2f   : > { %791 = vmatprep.subr.bf16.mxu1 %v1612_v13  ;;  %416 = vperm.xlu0 %1595, %v342_v4   ;;  %v1675_v13 = vld [vmem:[%s2433_s1 + $0x64] ss:$12 sps:$4 sm:$0xff]   ;;  %v1687_v19 = vld [vmem:[%s2433_s1 + $0xac] ss:$12 sps:$4 sm:$0xff]   ;;  %p1820_p11 = scmp.ne.s32.totalorder %s2341_s8, %s1819_s15  ;;  %s1823_s17 = sshll.u32 %s1916_s16, 4  ;;  %s1824_s17 = int_to_ptr.vmem [resolvable:$false] %s1823_s17 }
  0x30   : > { %421 = vperm.xlu1 %1596, %v343_v5   ;;  %s1825_s23 = scalar_lea.vmem %s1824_s17, 2048  ;;  %p1826_p0 = scmp.lt.s32.totalorder %s2341_s8, %s1824_s17 }
  0x31   : > { %903 = vmatpush1.bf16.msra.mxu0 %v776_v31  ;;  %p1821_p12 = pnand %p1820_p11, %p1988_p5  ;;  %p1827_p1 = scmp.lt.s32.totalorder %s1825_s23, %s1819_s15 }
  0x32   : > { %792 = vmatpush1.bf16.msra.mxu1 %v1614_v16  ;;  %v1682_v16 = vld [vmem:[%s2433_s1 + $0x78] ss:$12 sps:$4 sm:$0xff]  }
  0x33   : > { %793 = vmatprep.subr.bf16.mxu1 %v1615_v17  ;;  %v1683_v17 = vld [vmem:[%s2433_s1 + $0x94] ss:$12 sps:$4 sm:$0xff]   ;;  %p1822_p13 = pneg %p1821_p12  ;;  %p1828_p2 = por %p1827_p1, %p1826_p0 }
  0x34   : > { %1440 = vmatmul.mubr.msk.bf16.vlgmr.msra.gmra.mrb[0].mxu0 %vm749_vm1, %v1662_v33 }
  0x35   : > { %936 = vmatprep.mubr.bf16.mxu0 %v1915_v0  ;;  %p1829_p3 = pnand %p1828_p2, %p1822_p13 }
  0x36   : > { %794 = vmatpush1.bf16.msra.mxu1 %v1617_v20  ;;  %v1690_v20 = vld [vmem:[%s2433_s1 + $0xa8] ss:$12 sps:$4 sm:$0xff]  }
  0x37   : > { %795 = vmatprep.subr.bf16.mxu1 %v1618_v23 }
  0x3a   : > { %796 = vmatpush1.bf16.msra.mxu1 %v1620_v26 }
  0x3b   : > { %797 = vmatprep.subr.bf16.mxu1 %v1621_v29 }
  0x3c   : > { %1441 = vmatmul.mubr.msk.bf16.gmra.mrb[4].mxu0 %vm749_vm1, %v1665_v40 }
  0x3d   : > { %946 = vmatprep.mubr.bf16.mxu0 %v1915_v0 }
  0x3e   : > { %798 = vmatpush1.bf16.msra.mxu1 %v1623_v30 }
  0x3f   : > { %799 = vmatprep.subr.bf16.mxu1 %v1624_v32 }
  0x42   : > { %800 = vmatpush1.bf16.msra.mxu1 %v1626_v34 }
  0x43   : > { %801 = vmatprep.subr.bf16.mxu1 %v1627_v35 }
  0x44   : > { %1442 = vmatmul.mubr.msk.bf16.gmra.mrb[8].mxu0 %vm749_vm1, %v1669_v49 }
  0x45   : > { %956 = vmatprep.mubr.bf16.mxu0 %v1915_v0 }
  0x46   : > { %802 = vmatpush1.bf16.msra.mxu1 %v1629_v36 }
  0x47   : > { %803 = vmatprep.subr.bf16.mxu1 %v1632_v39 }
  0x4a   : > { %804 = vmatpush1.bf16.msra.mxu1 %v1635_v43 }
  0x4b   : > { %805 = vmatprep.subr.bf16.mxu1 %v1638_v44 }
  0x4c   : > { %1443 = vmatmul.mubr.msk.bf16.gmra.mrb[12].mxu0 %vm749_vm1, %v1673_v58 }
  0x4d   : > { %966 = vmatprep.mubr.bf16.mxu0 %v1915_v0 }
  0x4e   : > { %806 = vmatpush1.bf16.msra.mxu1 %v1641_v47 }
  0x4f   : > { %807 = vmatprep.subr.bf16.mxu1 %v1644_v48 }
  0x52   : > { %808 = vmatpush1.bf16.msra.mxu1 %v1647_v52 }
  0x53   : > { %809 = vmatprep.subr.bf16.mxu1 %v1650_v53 }
  0x54   : > { %1444 = vmatmul.mubr.msk.bf16.gmra.mrb[16].mxu0 %vm749_vm1, %v1677_v3 }
  0x55   : > { %976 = vmatprep.mubr.bf16.mxu0 %v1915_v0 }
  0x56   : > { %810 = vmatpush1.bf16.msra.mxu1 %v1653_v56 }
  0x57   : > { %811 = vmatprep.subr.bf16.mxu1 %v1655_v57 }
  0x5a   : > { %812 = vmatpush1.bf16.msra.mxu1 %v1658_v61 }
  0x5c   : > { %1445 = vmatmul.mubr.msk.bf16.gmra.mrb[20].mxu0 %vm749_vm1, %v1681_v8 }
  0x5d   : > { %814 = vmatmul.mubr.bf16.vlgmr.msra.gmra.mrb[0].mxu1 %v1659_v63  ;;  %986 = vmatprep.mubr.bf16.mxu0 %v1915_v0 }
  0x5e   : > { %823 = vmatprep.mubr.bf16.mxu1 %v1663_v2 }
  0x64   : > { %1446 = vmatmul.mubr.msk.bf16.gmra.mrb[24].mxu0 %vm749_vm1, %v1685_v11 }
  0x65   : > { %824 = vmatmul.mubr.bf16.gmra.mrb[4].mxu1 %v1666_v6  ;;  %996 = vmatprep.mubr.bf16.mxu0 %v1915_v0  ;;  %v1679_v0 = vld [vmem:[%s2433_s1 + $0x7c] ss:$12 sps:$4 sm:$0xff]  }
  0x66   : > { %833 = vmatprep.mubr.bf16.mxu1 %v1667_v7 }
  0x6c   : > { %1447 = vmatmul.mubr.msk.bf16.gmra.mrb[28].mxu0 %vm749_vm1, %v1689_v14 }
  0x6d   : > { %834 = vmatmul.mubr.bf16.gmra.mrb[8].mxu1 %v1670_v9 }
  0x6e   : > { %843 = vmatprep.mubr.bf16.mxu1 %v1671_v10 }
  0x75   : > { %844 = vmatmul.mubr.bf16.gmra.mrb[12].mxu1 %v1674_v12 }
  0x76   : > { %853 = vmatprep.mubr.bf16.mxu1 %v1675_v13 }
  0x7d   : > { %854 = vmatmul.mubr.bf16.gmra.mrb[16].mxu1 %v1678_v15 }
  0x7e   : > { %863 = vmatprep.mubr.bf16.mxu1 %v1679_v0 }
  0x85   : > { %864 = vmatmul.mubr.bf16.gmra.mrb[20].mxu1 %v1682_v16 }
  0x86   : > { %873 = vmatprep.mubr.bf16.mxu1 %v1683_v17 }
  0x8d   : > { %874 = vmatmul.mubr.bf16.gmra.mrb[24].mxu1 %v1686_v18 }
  0x8e   : > { %883 = vmatprep.mubr.bf16.mxu1 %v1687_v19 }
  0x91   : > { %v347_v33 = vpop.permute.xlu0 %346  ;;  %v357_v49 = vpop.permute.xlu1 %356 }
  0x95   : > { %884 = vmatmul.mubr.bf16.gmra.mrb[28].mxu1 %v1690_v20  ;;  %v352_v39 = vpop.permute.xlu0 %351  ;;  %v362_v60 = vpop.permute.xlu1 %361 }
  0x99   : > { %v367_v14 = vpop.permute.xlu0 %366  ;;  %v372_v18 = vpop.permute.xlu1 %371 }
 0x107   : > { %v928_v21 = vpop.f32.mrb[0].mxu0 }
 0x108   : > { %v930_v22 = vpop.f32.mrb[1].mxu0 }
 0x109   : > { %v932_v23 = vpop.f32.mrb[2].mxu0 }
 0x10a   : > { %v934_v24 = vpop.f32.mrb[3].mxu0 }
 0x10f   : > { %v938_v25 = vpop.f32.mrb[4].mxu0 }
 0x110   : > { %v940_v26 = vpop.f32.mrb[5].mxu0 }
 0x111   : > { %v942_v27 = vpop.f32.mrb[6].mxu0 }
 0x112   : > { %v944_v28 = vpop.f32.mrb[7].mxu0 }
 0x117   : > { %v948_v29 = vpop.f32.mrb[8].mxu0 }
 0x118   : > { %v2187_v30 = vpop.f32.mrb[9].mxu0 }
 0x119   : > { %v2189_v31 = vpop.f32.mrb[10].mxu0 }
 0x11a   : > { %v2191_v32 = vpop.f32.mrb[11].mxu0 }
 0x11f   : > { %v2193_v34 = vpop.f32.mrb[12].mxu0 }
 0x120   : > { %v2195_v35 = vpop.f32.mrb[13].mxu0 }
 0x121   : > { %v2197_v36 = vpop.f32.mrb[14].mxu0 }
 0x122   : > { %v2199_v37 = vpop.f32.mrb[15].mxu0 }
 0x127   : > { %v2201_v47 = vpop.f32.mrb[16].mxu0 }
 0x128   : > { %v2203_v51 = vpop.f32.mrb[17].mxu0 }
 0x129   : > { %v2205_v53 = vpop.f32.mrb[18].mxu0 }
 0x12a   : > { %v2207_v55 = vpop.f32.mrb[19].mxu0 }
 0x12f   : > { %v2209_v4 = vpop.f32.mrb[20].mxu0 }
 0x130   : > { %v815_v38 = vpop.f32.mrb[0].mxu1  ;;  %v2211_v8 = vpop.f32.mrb[21].mxu0 }
 0x131   : > { %v816_v40 = vadd.f32 %v815_v38, %v347_v33  ;;  %v817_v41 = vpop.f32.mrb[1].mxu1  ;;  %v2213_v10 = vpop.f32.mrb[22].mxu0 }
 0x132   : > { %v818_v42 = vadd.f32 %v817_v41, %v347_v33  ;;  %v819_v43 = vpop.f32.mrb[2].mxu1  ;;  %v2215_v12 = vpop.f32.mrb[23].mxu0 }
 0x133   : > { %v929_v44 = vadd.f32 %v928_v21, %v816_v40  ;;  %v820_v45 = vadd.f32 %v819_v43, %v352_v39  ;;  %v821_v46 = vpop.f32.mrb[3].mxu1 }
 0x134   : > { %v931_v48 = vadd.f32 %v930_v22, %v818_v42  ;;  %v822_v50 = vadd.f32 %v821_v46, %v352_v39 }
 0x135   : > { %v933_v52 = vadd.f32 %v932_v23, %v820_v45  ;;  %v1448_v59 = vmul.f32 -1.442695, %v929_v44  ;;  %v377_v45 = vpop.permute.xlu0 %376 }
 0x136   : > { %v935_v54 = vadd.f32 %v934_v24, %v822_v50  ;;  %v1449_v63 = vmul.f32 -1.442695, %v931_v48 }
 0x137   : > { %v1450_v5 = vmul.f32 -1.442695, %v933_v52  ;;  %1691 = vpow2.f32 %v1448_v59 }
 0x138   : > { %v825_v56 = vpop.f32.mrb[4].mxu1  ;;  %1693 = vpow2.f32 %v1449_v63  ;;  %v1451_v13 = vmul.f32 -1.442695, %v935_v54  ;;  %v382_v54 = vpop.permute.xlu1 %381 }
 0x139   : > { %v826_v57 = vadd.f32 %v825_v56, %v357_v49  ;;  %v827_v58 = vpop.f32.mrb[5].mxu1  ;;  %1695 = vpow2.f32 %v1450_v5 }
 0x13a   : > { %v828_v61 = vadd.f32 %v827_v58, %v357_v49  ;;  %v829_v62 = vpop.f32.mrb[6].mxu1  ;;  %1697 = vpow2.f32 %v1451_v13 }
 0x13b   : > { %v939_v1 = vadd.f32 %v938_v25, %v826_v57  ;;  %v830_v2 = vadd.f32 %v829_v62, %v362_v60  ;;  %v831_v3 = vpop.f32.mrb[7].mxu1  ;;  %v2217_v25 = vpop.f32.mrb[24].mxu0 }
 0x13c   : > { %v941_v6 = vadd.f32 %v940_v26, %v828_v61  ;;  %v832_v7 = vadd.f32 %v831_v3, %v362_v60  ;;  %v2220_v33 = vpop.f32.mrb[25].mxu0 }
 0x13d   : > { %v943_v9 = vadd.f32 %v942_v27, %v830_v2  ;;  %v1452_v0 = vmul.f32 -1.442695, %v939_v1  ;;  %v2223_v40 = vpop.f32.mrb[26].mxu0 }
 0x13e   : > { %v945_v11 = vadd.f32 %v944_v28, %v832_v7  ;;  %v1453_v21 = vmul.f32 -1.442695, %v941_v6 }
 0x13f   : > { %v1454_v26 = vmul.f32 -1.442695, %v943_v9  ;;  %1699 = vpow2.f32 %v1452_v0 }
 0x140   : > { %v835_v15 = vpop.f32.mrb[8].mxu1  ;;  %v1455_v38 = vmul.f32 -1.442695, %v945_v11  ;;  %1701 = vpow2.f32 %v1453_v21  ;;  %v392_v21 = vpop.permute.xlu1 %391 }
 0x141   : > { %v836_v16 = vadd.f32 %v835_v15, %v367_v14  ;;  %v837_v17 = vpop.f32.mrb[9].mxu1  ;;  %v1692_v44 = vpop.eup %1691  ;;  %1703 = vpow2.f32 %v1454_v26 }
 0x142   : > { %v838_v19 = vadd.f32 %v837_v17, %v367_v14  ;;  %v839_v20 = vpop.f32.mrb[10].mxu1  ;;  %v1694_v48 = vpop.eup %1693  ;;  %1705 = vpow2.f32 %v1455_v38 }
 0x143   : > { %v949_v22 = vadd.f32 %v948_v29, %v836_v16  ;;  %v840_v23 = vadd.f32 %v839_v20, %v372_v18  ;;  %v841_v24 = vpop.f32.mrb[11].mxu1  ;;  %v2226_v29 = vpop.f32.mrb[27].mxu0  ;;  %v1032_v62 = vadd.f32 1.0, %v1694_v48 }
 0x144   : > { %v951_v27 = vadd.f32 %v2187_v30, %v838_v19  ;;  %v842_v28 = vadd.f32 %v841_v24, %v372_v18  ;;  %v2229_v61 = vpop.f32.mrb[28].mxu0  ;;  %v387_v15 = vpop.permute.xlu0 %386 }
 0x145   : > { %v953_v39 = vadd.f32 %v2189_v31, %v840_v23  ;;  %v1456_v41 = vmul.f32 -1.442695, %v949_v22  ;;  %v1696_v31 = vpop.eup %1695  ;;  %v2232_v2 = vpop.f32.mrb[29].mxu0 }
 0x146   : > { %v955_v42 = vadd.f32 %v2191_v32, %v842_v28  ;;  %v1457_v43 = vmul.f32 -1.442695, %v951_v27  ;;  %v1031_v32 = vadd.f32 1.0, %v1692_v44  ;;  %v1698_v3 = vpop.eup %1697  ;;  %v1033_v5 = vadd.f32 1.0, %v1696_v31  ;;  %v2235_v7 = vpop.f32.mrb[30].mxu0 }
 0x147   : > { %v1458_v30 = vmul.f32 -1.442695, %v953_v39  ;;  %1707 = vpow2.f32 %v1456_v41  ;;  %v2238_v11 = vpop.f32.mrb[31].mxu0 }
 0x148   : > { %v845_v46 = vpop.f32.mrb[12].mxu1  ;;  %v1459_v49 = vmul.f32 -1.442695, %v955_v42  ;;  %1709 = vpow2.f32 %v1457_v43 }
 0x149   : > { %v846_v50 = vadd.f32 %v845_v46, %v377_v45  ;;  %v847_v52 = vpop.f32.mrb[13].mxu1  ;;  %1711 = vpow2.f32 %v1458_v30  ;;  %v1700_v13 = vpop.eup %1699 }
 0x14a   : > { %v848_v56 = vadd.f32 %v847_v52, %v377_v45  ;;  %v849_v57 = vpop.f32.mrb[14].mxu1  ;;  %1713 = vpow2.f32 %v1459_v49  ;;  %v1702_v16 = vpop.eup %1701  ;;  %v1035_v20 = vadd.f32 1.0, %v1700_v13 }
 0x14b   : > { %v959_v58 = vadd.f32 %v2193_v34, %v846_v50  ;;  %v850_v59 = vadd.f32 %v849_v57, %v382_v54  ;;  %v851_v60 = vpop.f32.mrb[15].mxu1  ;;  %1715 = vrcp.f32 %v1031_v32  ;;  %v1036_v39 = vadd.f32 1.0, %v1702_v16  ;;  %v397_v52 = vpop.permute.xlu0 %396 }
 0x14c   : > { %v961_v63 = vadd.f32 %v2195_v35, %v848_v56  ;;  %v852_v1 = vadd.f32 %v851_v60, %v382_v54  ;;  %1717 = vrcp.f32 %v1032_v62  ;;  %v1034_v35 = vadd.f32 1.0, %v1698_v3 }
 0x14d   : > { %v963_v6 = vadd.f32 %v2197_v36, %v850_v59  ;;  %v1460_v9 = vmul.f32 -1.442695, %v959_v58  ;;  %1719 = vrcp.f32 %v1033_v5  ;;  %v1704_v36 = vpop.eup %1703  ;;  %v402_v58 = vpop.permute.xlu1 %401 }
 0x14e   : > { %v965_v34 = vadd.f32 %v2199_v37, %v852_v1  ;;  %v1461_v14 = vmul.f32 -1.442695, %v961_v63  ;;  %v1706_v23 = vpop.eup %1705  ;;  %v1037_v44 = vadd.f32 1.0, %v1704_v36 }
 0x14f   : > { %v1462_v17 = vmul.f32 -1.442695, %v963_v6  ;;  %1721 = vpow2.f32 %v1460_v9  ;;  %v1038_v46 = vadd.f32 1.0, %v1706_v23  ;;  %v407_v36 = vpop.permute.xlu0 %406 }
 0x150   : > { %v855_v0 = vpop.f32.mrb[16].mxu1  ;;  %1723 = vpow2.f32 %v1461_v14  ;;  %v1463_v24 = vmul.f32 -1.442695, %v965_v34 }
 0x151   : > { %v856_v18 = vadd.f32 %v855_v0, %v387_v15  ;;  %v857_v19 = vpop.f32.mrb[17].mxu1  ;;  %v1708_v38 = vpop.eup %1707  ;;  %1725 = vrcp.f32 %v1034_v35 }
 0x152   : > { %v858_v22 = vadd.f32 %v857_v19, %v387_v15  ;;  %v859_v37 = vpop.f32.mrb[18].mxu1  ;;  %v1710_v43 = vpop.eup %1709  ;;  %1727 = vpow2.f32 %v1462_v17 }
 0x153   : > { %v969_v26 = vadd.f32 %v2201_v47, %v856_v18  ;;  %v860_v27 = vadd.f32 %v859_v37, %v392_v21  ;;  %v861_v28 = vpop.f32.mrb[19].mxu1  ;;  %v1712_v30 = vpop.eup %1711  ;;  %1729 = vrcp.f32 %v1035_v20  ;;  %v1079_v47 = vadd.f32 1.0, %v1708_v38 }
 0x154   : > { %v971_v41 = vadd.f32 %v2203_v51, %v858_v22  ;;  %v862_v42 = vadd.f32 %v861_v28, %v392_v21  ;;  %v1714_v49 = vpop.eup %1713  ;;  %1731 = vpow2.f32 %v1463_v24  ;;  %v1080_v50 = vadd.f32 1.0, %v1710_v43  ;;  %v412_v23 = vpop.permute.xlu1 %411 }
 0x155   : > { %v973_v45 = vadd.f32 %v2205_v53, %v860_v27  ;;  %1733 = vrcp.f32 %v1036_v39  ;;  %v2244_v54 = vpop.eup %1715  ;;  %v1081_v51 = vadd.f32 1.0, %v1712_v30  ;;  %v1082_v53 = vadd.f32 1.0, %v1714_v49 }
 0x156   : > { %v975_v48 = vadd.f32 %v2207_v55, %v862_v42  ;;  %1735 = vrcp.f32 %v1037_v44  ;;  %v2246_v32 = vpop.eup %1717  ;;  %v1464_v62 = vmul.f32 -1.442695, %v969_v26  ;;  %v1465_v6 = vmul.f32 -1.442695, %v971_v41 }
 0x157   : > { %1737 = vrcp.f32 %v1038_v46  ;;  %v2248_v60 = vpop.eup %1719  ;;  %v1466_v14 = vmul.f32 -1.442695, %v973_v45 }
 0x158   : > { %v865_v31 = vpop.f32.mrb[20].mxu1  ;;  %1739 = vrcp.f32 %v1079_v47  ;;  %v1467_v0 = vmul.f32 -1.442695, %v975_v48 }
 0x159   : > { %v866_v56 = vadd.f32 %v865_v31, %v397_v52  ;;  %v867_v57 = vpop.f32.mrb[21].mxu1  ;;  %v1722_v5 = vpop.eup %1721  ;;  %1741 = vrcp.f32 %v1080_v50 }
 0x15a   : > { %v868_v59 = vadd.f32 %v867_v57, %v397_v52  ;;  %v869_v55 = vpop.f32.mrb[22].mxu1  ;;  %v1724_v13 = vpop.eup %1723  ;;  %1743 = vrcp.f32 %v1081_v51  ;;  %v1083_v17 = vadd.f32 1.0, %v1722_v5 }
 0x15b   : > { %v979_v63 = vadd.f32 %v2209_v4, %v866_v56  ;;  %v870_v1 = vadd.f32 %v869_v55, %v402_v58  ;;  %v871_v3 = vpop.f32.mrb[23].mxu1  ;;  %v2253_v15 = vpop.eup %1725  ;;  %1745 = vrcp.f32 %v1082_v53  ;;  %v1084_v19 = vadd.f32 1.0, %v1724_v13 }
 0x15c   : > { %v981_v9 = vadd.f32 %v2211_v8, %v868_v59  ;;  %v872_v34 = vadd.f32 %v871_v3, %v402_v58  ;;  %v1728_v4 = vpop.eup %1727  ;;  %1747 = vpow2.f32 %v1464_v62 }
 0x15d   : > { %v983_v35 = vadd.f32 %v2213_v10, %v870_v1  ;;  %v2256_v18 = vpop.eup %1729  ;;  %1749 = vpow2.f32 %v1465_v6  ;;  %v1085_v37 = vadd.f32 1.0, %v1728_v4  ;;  %v1468_v27 = vmul.f32 -1.442695, %v979_v63 }
 0x15e   : > { %v985_v16 = vadd.f32 %v2215_v12, %v872_v34  ;;  %v1732_v20 = vpop.eup %1731  ;;  %1751 = vpow2.f32 %v1466_v14  ;;  %v1469_v30 = vmul.f32 -1.442695, %v981_v9  ;;  %v1159_v34 = vld [vmem:[%s2278_s26] sm:$0xff] }
 0x15f   : > { %v2258_v10 = vpop.eup %1733  ;;  %1753 = vpow2.f32 %v1467_v0  ;;  %v1086_v42 = vadd.f32 1.0, %v1732_v20  ;;  %v1470_v56 = vmul.f32 -1.442695, %v983_v35  ;;  %v1161_v20 = vld [vmem:[%s2278_s26 + $0x10] sm:$0xff] }
 0x160   : > { %v875_v8 = vpop.f32.mrb[24].mxu1  ;;  %v2260_v26 = vpop.eup %1735  ;;  %1755 = vrcp.f32 %v1083_v17  ;;  %v1471_v59 = vmul.f32 -1.442695, %v985_v16 }
 0x161   : > { %v876_v21 = vadd.f32 %v875_v8, %v407_v36  ;;  %v877_v22 = vpop.f32.mrb[25].mxu1  ;;  %v2263_v41 = vpop.eup %1737  ;;  %1757 = vrcp.f32 %v1084_v19  ;;  %v1160_v19 = vld [vmem:[%s2278_s26 + $0x8] sm:$0xff] }
 0x162   : > { %v878_v24 = vadd.f32 %v877_v22, %v407_v36  ;;  %v879_v12 = vpop.f32.mrb[26].mxu1  ;;  %v1740_v45 = vpop.eup %1739 }
 0x163   : > { %v989_v28 = vadd.f32 %v2217_v25, %v876_v21  ;;  %v880_v38 = vadd.f32 %v879_v12, %v412_v23  ;;  %v881_v39 = vpop.f32.mrb[27].mxu1  ;;  %v2267_v48 = vpop.eup %1741  ;;  %v1163_v12 = vld [vmem:[%s2278_s26 + $0x20] sm:$0xff] }
 0x164   : > { %v991_v43 = vadd.f32 %v2220_v33, %v878_v24  ;;  %v882_v44 = vadd.f32 %v881_v39, %v412_v23  ;;  %v2270_v49 = vpop.eup %1743  ;;  %v417_v33 = vpop.permute.xlu0 %416  ;;  %v1168_v24 = vmul.f32 %v2267_v48, %v1160_v19 }
 0x165   : > { %1759 = vtanh.f32 %v989_v28  ;;  %v993_v46 = vadd.f32 %v2223_v40, %v880_v38  ;;  %v2273_v47 = vpop.eup %1745  ;;  %v1169_v38 = vmul.f32 %v2270_v49, %v1161_v20 }
 0x166   : > { %1761 = vrcp.f32 %v1085_v37  ;;  %v995_v25 = vadd.f32 %v2226_v29, %v882_v44  ;;  %v1748_v52 = vpop.eup %1747  ;;  %v422_v29 = vpop.permute.xlu1 %421  ;;  %v1162_v37 = vld [vmem:[%s2278_s26 + $0x18] sm:$0xff] }
 0x167   : > { %1763 = vpow2.f32 %v1468_v27  ;;  %v1750_v40 = vpop.eup %1749  ;;  %v1127_v3 = vadd.f32 1.0, %v1748_v52 }
 0x168   : > { %1765 = vrcp.f32 %v1086_v42  ;;  %v885_v50 = vpop.f32.mrb[28].mxu1  ;;  %v1752_v58 = vpop.eup %1751  ;;  %v1128_v13 = vadd.f32 1.0, %v1750_v40 }
 0x169   : > { %1767 = vpow2.f32 %v1469_v30  ;;  %v886_v31 = vadd.f32 %v885_v50, %v417_v33  ;;  %v887_v51 = vpop.f32.mrb[29].mxu1  ;;  %v1754_v1 = vpop.eup %1753  ;;  %v1129_v36 = vadd.f32 1.0, %v1752_v58  ;;  %v1165_v50 = vld [vmem:[%s2278_s26 + $0x30] sm:$0xff] }
 0x16a   : > { %1769 = vtanh.f32 %v991_v43  ;;  %v888_v57 = vadd.f32 %v887_v51, %v417_v33  ;;  %v889_v53 = vpop.f32.mrb[30].mxu1  ;;  %v1756_v9 = vpop.eup %1755  ;;  %v1130_v21 = vadd.f32 1.0, %v1754_v1  ;;  %v1170_v43 = vmul.f32 %v2273_v47, %v1162_v37  ;;  %v1164_v47 = vld [vmem:[%s2278_s26 + $0x28] sm:$0xff] }
 0x16b   : > { %1771 = vtanh.f32 %v993_v46  ;;  %v999_v55 = vadd.f32 %v2229_v61, %v886_v31  ;;  %v890_v62 = vadd.f32 %v889_v53, %v422_v29  ;;  %v891_v63 = vpop.f32.mrb[31].mxu1  ;;  %v2287_v35 = vpop.eup %1757 }
 0x16c   : > { %1773 = vtanh.f32 %v995_v25  ;;  %v1001_v5 = vadd.f32 %v2232_v2, %v888_v57  ;;  %v892_v6 = vadd.f32 %v891_v63, %v422_v29  ;;  %v1167_v2 = vmul.f32 %v1740_v45, %v1159_v34  ;;  %v1166_v29 = vld [vmem:[%s2278_s26 + $0x38] sm:$0xff] }
 0x16d   : > { %1775 = vtanh.f32 %v999_v55  ;;  %v1003_v14 = vadd.f32 %v2235_v7, %v890_v62  ;;  %v1172_v40 = vmul.f32 %v2287_v35, %v1164_v47 }
 0x16e   : > { %1777 = vpow2.f32 %v1470_v56  ;;  %v1005_v61 = vadd.f32 %v2238_v11, %v892_v6 }
 0x16f   : > { %v1760_v0 = vpop.eup %1759  ;;  %1779 = vpow2.f32 %v1471_v59 }
 0x170   : > { %v2291_v16 = vpop.eup %1761  ;;  %1781 = vrcp.f32 %v1127_v3  ;;  %v1175_v4 = vmul.f32 %v1760_v0, %v2244_v54 }
 0x171   : > { %v1764_v17 = vpop.eup %1763  ;;  %1783 = vrcp.f32 %v1128_v13  ;;  %v1173_v53 = vmul.f32 %v2291_v16, %v1165_v50 }
 0x172   : > { %v2294_v7 = vpop.eup %1765  ;;  %v1183_v8 = vadd.f32 %v1175_v4, %v1167_v2  ;;  %1785 = vtanh.f32 %v1001_v5  ;;  %v1131_v23 = vadd.f32 1.0, %v1764_v17 }
 0x173   : > { %v1768_v11 = vpop.eup %1767  ;;  %1787 = vtanh.f32 %v1003_v14  ;;  %v1174_v3 = vmul.f32 %v2294_v7, %v1166_v29 }
 0x174   : > { %v1770_v22 = vpop.eup %1769  ;;  %1789 = vtanh.f32 %v1183_v8  ;;  %1215 = vst [vmem:[%s2301_s11] sm:$0xff] %v1183_v8  ;;  %v1132_v52 = vadd.f32 1.0, %v1768_v11 }
 0x175   : > { %v1772_v54 = vpop.eup %1771  ;;  %v1176_v27 = vmul.f32 %v1770_v22, %v2246_v32  ;;  %1791 = vtanh.f32 %v1005_v61  ;;  %v1171_v32 = vmul.f32 %v1756_v9, %v1163_v12 }
 0x176   : > { %v1774_v28 = vpop.eup %1773  ;;  %1793 = vrcp.f32 %v1129_v36  ;;  %v1177_v39 = vmul.f32 %v1772_v54, %v2248_v60 }
 0x177   : > { %v1776_v42 = vpop.eup %1775  ;;  %1795 = vrcp.f32 %v1130_v21  ;;  %v1184_v44 = vadd.f32 %v1176_v27, %v1168_v24  ;;  %v1178_v45 = vmul.f32 %v1774_v28, %v2253_v15 }
 0x178   : > { %v1778_v30 = vpop.eup %1777  ;;  %1797 = vrcp.f32 %v1131_v23  ;;  %v1185_v46 = vadd.f32 %v1177_v39, %v1169_v38  ;;  %v1179_v48 = vmul.f32 %v1776_v42, %v2256_v18 }
 0x179   : > { %v1780_v25 = vpop.eup %1779  ;;  %1799 = vtanh.f32 %v1184_v44  ;;  %1216 = vst [vmem:[%s2301_s11 + $0x8] sm:$0xff] %v1184_v44  ;;  %v1186_v60 = vadd.f32 %v1178_v45, %v1170_v43  ;;  %v1133_v51 = vadd.f32 1.0, %v1778_v30 }
 0x17a   : > { %v1782_v49 = vpop.eup %1781  ;;  %1801 = vtanh.f32 %v1185_v46  ;;  %1217 = vst [vmem:[%s2301_s11 + $0x10] sm:$0xff] %v1185_v46  ;;  %v1187_v33 = vadd.f32 %v1179_v48, %v1171_v32  ;;  %v1134_v55 = vadd.f32 1.0, %v1780_v25 }
 0x17b   : > { %v1784_v15 = vpop.eup %1783  ;;  %1803 = vtanh.f32 %v1186_v60  ;;  %1218 = vst [vmem:[%s2301_s11 + $0x18] sm:$0xff] %v1186_v60 }
 0x17c   : > { %v1786_v31 = vpop.eup %1785  ;;  %1805 = vtanh.f32 %v1187_v33  ;;  %1219 = vst [vmem:[%s2301_s11 + $0x20] sm:$0xff] %v1187_v33 }
 0x17d   : > { %v1788_v18 = vpop.eup %1787  ;;  %v1180_v56 = vmul.f32 %v1786_v31, %v2258_v10  ;;  %1807 = vrcp.f32 %v1132_v52 }
 0x17e   : > { %v1790_v57 = vpop.eup %1789  ;;  %v1181_v58 = vmul.f32 %v1788_v18, %v2260_v26  ;;  %1809 = vrcp.f32 %v1133_v51 }
 0x17f   : > { %v1792_v59 = vpop.eup %1791  ;;  %v1199_v62 = vmul.f32 %v1790_v57, %v1782_v49  ;;  %v1188_v63 = vadd.f32 %v1180_v56, %v1172_v40 }
 0x180   : > { %v1794_v1 = vpop.eup %1793  ;;  %v1189_v10 = vadd.f32 %v1181_v58, %v1173_v53  ;;  %v1182_v5 = vmul.f32 %v1792_v59, %v2263_v41 }
 0x181   : > { %v1796_v6 = vpop.eup %1795  ;;  %1207 = vst [vmem:[%s2329_s9] sm:$0xff] %v1199_v62  ;;  %1811 = vtanh.f32 %v1188_v63  ;;  %1220 = vst [vmem:[%s2301_s11 + $0x28] sm:$0xff] %v1188_v63 }
 0x182   : > { %v1798_v26 = vpop.eup %1797  ;;  %1813 = vtanh.f32 %v1189_v10  ;;  %1221 = vst [vmem:[%s2301_s11 + $0x30] sm:$0xff] %v1189_v10  ;;  %v1190_v9 = vadd.f32 %v1182_v5, %v1174_v3 }
 0x183   : > { %v1800_v41 = vpop.eup %1799  ;;  %1815 = vrcp.f32 %v1134_v55 }
 0x184   : > { %v1802_v34 = vpop.eup %1801  ;;  %v1200_v13 = vmul.f32 %v1800_v41, %v1784_v15  ;;  %1817 = vtanh.f32 %v1190_v9  ;;  %1222 = vst [vmem:[%s2301_s11 + $0x38] sm:$0xff] %v1190_v9 }
 0x185   : > { %v1804_v14 = vpop.eup %1803  ;;  %v1201_v35 = vmul.f32 %v1802_v34, %v1794_v1 }
 0x186   : > { %1832 = shalt.err (!%p1829_p3)
}
 0x187   : > { %s1833_s25 = scalar_lea.hbm %s2339_s13, 1024  ;;  %s1837_s11 = scalar_lea.hbm %s2437_s5, 2048 }
 0x188   : > { %p1834_p4 = scmp.ne.s32.totalorder %s2339_s13, %s1833_s25  ;;  %p1838_p9 = scmp.lt.u32.totalorder %s2339_s13, %s2437_s5 }
 0x189   : > { %p1839_p10 = scmp.lt.u32.totalorder %s1837_s11, %s1833_s25  ;;  %p1841_p12 = scmp.lt.u32.totalorder %s1833_s25, %s2339_s13 }
 0x18a   : > { %p1835_p7 = pnand %p1834_p4, %p1988_p5 }
 0x18b   : > { %p1840_p11 = por %p1839_p10, %p1838_p9 }
 0x18c   : > { %p1836_p8 = pneg %p1835_p7 }
 0x18d   : > { %p1842_p13 = por %p1841_p12, %p1840_p11 }
 0x18f   : > { %p1843_p0 = pnand %p1842_p13, %p1836_p8 }
 0x191   : > { %1846 = shalt.err (!%p1843_p0)
}
 0x192   : > { %s1917_s15 = smov 256   ;;  %s1918_s16 = smov 16   ;;  %v1806_v61 = vpop.eup %1805  ;;  %1208 = vst [vmem:[%s2329_s9 + $0x8] sm:$0xff] %v1200_v13  ;;  %v1202_v0 = vmul.f32 %v1804_v14, %v1796_v6  ;;  %1209 = vst [vmem:[%s2329_s9 + $0x10] sm:$0xff] %v1201_v35 }
 0x193   : > { %1549 = dma.vmem_to_hbm [thread:$0]  (%p1988_p5), %s2341_s8, 1024, %s2339_s13, %s1229_s14, %s1917_s15, %s1917_s15, %s1918_s16   ;;  %v1203_v16 = vmul.f32 %v1806_v61, %v1798_v26  ;;  %v1808_v2 = vpop.eup %1807 }
 0x194   : > { %1210 = vst [vmem:[%s2329_s9 + $0x18] sm:$0xff] %v1202_v0  ;;  %v1810_v4 = vpop.eup %1809  ;;  %s1242_s17 = sshll.u32 %s2329_s9, 4  ;;  %s2383_s14 = scalar_lea.hbm %s2436_s4, %s1481_s6  ;;  %s2385_s17 = int_to_ptr.vmem [resolvable:$true] %s1242_s17 }
 0x195   : > { %1211 = vst [vmem:[%s2329_s9 + $0x20] sm:$0xff] %v1203_v16  ;;  %v1812_v17 = vpop.eup %1811  ;;  %s1224_s23 = scalar_lea.sflag [#allocation3], %s2281_s7  ;;  %s1847_s25 = scalar_lea.vmem %s2385_s17, 1024 }
 0x196   : > { %v1814_v7 = vpop.eup %1813  ;;  %v1204_v19 = vmul.f32 %v1812_v17, %v1808_v2  ;;  %p1848_p1 = scmp.ne.s32.totalorder %s2385_s17, %s1847_s25  ;;  %s1919_s26 = smov [#allocation2]  }
 0x197   : > { %v1816_v36 = vpop.eup %1815  ;;  %v1205_v8 = vmul.f32 %v1814_v7, %v1810_v4  ;;  %s1851_s30 = sshll.u32 %s1919_s26, 4  ;;  %s1852_s30 = int_to_ptr.vmem [resolvable:$false] %s1851_s30 }
 0x198   : > { %v1818_v11 = vpop.eup %1817  ;;  %1212 = vst [vmem:[%s2329_s9 + $0x28] sm:$0xff] %v1204_v19  ;;  %p1849_p2 = pnand %p1848_p1, %p1988_p5  ;;  %s1853_s22 = scalar_lea.vmem %s1852_s30, 2048 }
 0x199   : > { %1213 = vst [vmem:[%s2329_s9 + $0x30] sm:$0xff] %v1205_v8  ;;  %v1206_v20 = vmul.f32 %v1818_v11, %v1816_v36  ;;  %p1854_p4 = scmp.lt.s32.totalorder %s2385_s17, %s1852_s30  ;;  %p1855_p7 = scmp.lt.s32.totalorder %s1853_s22, %s1847_s25 }
 0x19a   : > { %p1850_p3 = pneg %p1849_p2 }
 0x19b   : > { %1214 = vst [vmem:[%s2329_s9 + $0x38] sm:$0xff] %v1206_v20  ;;  %p1856_p8 = por %p1855_p7, %p1854_p4 }
 0x19d   : > { %p1857_p9 = pnand %p1856_p8, %p1850_p3 }
 0x19f   : > { %1860 = shalt.err (!%p1857_p9)
}
 0x1a0   : > { %s1861_s6 = scalar_lea.hbm %s2383_s14, 1024  ;;  %s1865_s10 = scalar_lea.hbm %s2436_s4, 2048 }
 0x1a1   : > { %p1862_p10 = scmp.ne.s32.totalorder %s2383_s14, %s1861_s6  ;;  %p1866_p13 = scmp.lt.u32.totalorder %s2383_s14, %s2436_s4 }
 0x1a2   : > { %p1867_p0 = scmp.lt.u32.totalorder %s1865_s10, %s1861_s6  ;;  %p1869_p2 = scmp.lt.u32.totalorder %s1861_s6, %s2383_s14 }
 0x1a3   : > { %p1863_p11 = pnand %p1862_p10, %p1988_p5 }
 0x1a4   : > { %p1868_p1 = por %p1867_p0, %p1866_p13 }
 0x1a5   : > { %p1864_p12 = pneg %p1863_p11 }
 0x1a6   : > { %p1870_p3 = por %p1869_p2, %p1868_p1 }
 0x1a8   : > { %p1871_p4 = pnand %p1870_p3, %p1864_p12 }
 0x1aa   : > { %1874 = shalt.err (!%p1871_p4)
}
 0x1ab   : > { %1548 = dma.vmem_to_hbm [thread:$0]  (%p1988_p5), %s2385_s17, 1024, %s2383_s14, %s1224_s23, %s1917_s15, %s1917_s15, %s1918_s16  }
 0x1ac PF: > { %p1559_p7 = scmp.ge.s32.totalorder %s1913_s21, 2  ;;  %s1273_s13 = sand.u32 1, %s1901_s18  }
 0x1ad   : > { %s1274_s25 = scalar_lea.sflag [#allocation3], %s1273_s13 }
 0x1ae   : > { %p1553_p8 = pnand %p1559_p7, %p1992_p6 }
 0x1b0   : > { %1892 = dma.done.wait (!%p1553_p8), %s1274_s25, 1024  }
 0x1b1   : > { %1894 = vsyncadd (!%p1553_p8), %s1274_s25, 4294966272  ;;  %s1283_s28 = scalar_lea.sflag [#allocation5], %s1273_s13 }
 0x1b2   : > { %1896 = dma.done.wait (!%p1553_p8), %s1283_s28, 1024  }
 0x1b3   : > { %1898 = vsyncadd (!%p1553_p8), %s1283_s28, 4294966272  ;;  %p19_p5 = scmp.ge.s32.totalorder %s1975_s24, 4   ;;  %s2440_s18 = smov %s1905_s19 }
 0x1b4   : > { %s2441_s19 = smov %s1909_s20  ;;  %s2442_s20 = smov %s1986_s27 }
 0x1b5   : > { %s2443_s21 = smov %s1975_s24  ;;  %21 = sbr.rel (!%p19_p5) target bundleno = 5 (0x5), region = 91 }
 0x1bc   :  { %1288 = vsyncpa [#allocation3], 1 }
 0x1bd   :  { %1290 = vsyncpa [#allocation3 + $0x1], 1 }
 0x1be   :  { %1291 = vsyncpa [#allocation5], 1 }
 0x1bf   :  { %1293 = vsyncpa [#allocation5 + $0x1], 1 }

</bundles_post_ra>
